<compile_context>
chip_gen: v7x
topology: tpu7x:2x2x1
jax: 0.10.0
libtpu: 0.0.40
codegen_flags: <defaults>
</compile_context>

<pallas_src>
import functools

import jax
import jax.numpy as jnp
from jax import lax
from jax.experimental import pallas as pl
from jax.experimental.pallas import tpu as pltpu


def _round_up(x, m):
    return ((x + m - 1) // m) * m


def _nonlinearity(name):
    if name == "tanh":
        return jnp.tanh
    if name == "relu":
        return lambda v: jnp.maximum(v, jnp.float32(0.0))
    raise ValueError(f"unsupported nonlinearity: {name!r}")


def _rate_model_kernel(x_ref, wxt_ref, wt_ref, o_ref, *,
                       nt, eta, matmul_dtype, nonlinearity):
    """One batch tile: input drive + (Nt-1)-step Euler recurrence + nonlinearity."""
    f = _nonlinearity(nonlinearity)

    eta_f = jnp.float32(eta)
    one_minus_eta = jnp.float32(1.0 - eta)

    # Cast only the MXU operands; all state / VPU / EUP work stays f32.
    cast_operands = matmul_dtype != jnp.float32
    to_mx = (lambda a: a.astype(matmul_dtype)) if cast_operands else (lambda a: a)

    # Input drive with eta folded in (computed once per batch tile, f32 accumulate).
    drive = eta_f * jnp.dot(x_ref[...], wxt_ref[...],
                            preferred_element_type=jnp.float32)        # (tb, N)

    # Recurrent weights with eta folded in; cast once to the MXU operand dtype.
    eta_wt = to_mx(eta_f * wt_ref[...])                                # (N, N)

    # Peeled step 0: v0 = 0 => f(v0) = 0 => v1 = drive.
    # Carry (v, f(v)): the last loop iteration's tanh is the kernel output.
    v = drive
    fv = f(v)

    def step(_, carry):
        v, fv = carry
        rec = jnp.dot(to_mx(fv), eta_wt, preferred_element_type=jnp.float32)
        v_new = one_minus_eta * v + rec + drive
        return v_new, f(v_new)

    if nt > 1:
        # Small static trip count: fully unroll for LLO scheduler visibility.
        v, fv = lax.fori_loop(1, nt, step, (v, fv), unroll=True)

    o_ref[...] = fv.astype(o_ref.dtype)


def rate_model_type2(x, wxt, wt, *, nt, eta, nonlinearity="tanh",
                     block_b=64, use_bf16_matmul=True):
    """Pallas wrapper. x:(B,Nx) f32, wxt:(Nx,N) f32, wt:(N,N) f32 -> (B,N) f32."""
    B, Nx = x.shape
    N = wt.shape[0]
    assert wxt.shape == (Nx, N)
    assert wt.shape == (N, N)
    assert nt >= 1, "Nt must be >= 1"

    # Batch tiling:
    #  * pad to a sublane multiple (8),
    #  * cap the tile at block_b (64 default: keeps vreg pressure of the fully
    #    unrolled recurrence comfortable),
    #  * cap so there are >= 2 tiles whenever the padded batch is >= 16, so the
    #    "parallel" grid axis actually shards across both v7x TensorCores.
    Bp8 = _round_up(B, 8)
    tb = min(_round_up(block_b, 8), Bp8)
    if Bp8 >= 16:
        tb = min(tb, _round_up((Bp8 + 1) // 2, 8))
    Bp = _round_up(Bp8, tb)
    if Bp != B:
        x = jnp.pad(x, ((0, Bp - B), (0, 0)))
    n_tiles = Bp // tb

    # bf16 MXU operands (f32 accumulation) are the native fast path on all
    # TPU generations; the f32 path is kept for exact-tolerance validation.
    matmul_dtype = jnp.bfloat16 if use_bf16_matmul else jnp.float32

    kernel = functools.partial(
        _rate_model_kernel, nt=int(nt), eta=float(eta),
        matmul_dtype=matmul_dtype, nonlinearity=nonlinearity)

    out = pl.pallas_call(
        kernel,
        out_shape=jax.ShapeDtypeStruct((Bp, N), jnp.float32),
        grid_spec=pl.GridSpec(
            grid=(n_tiles,),
            in_specs=[
                pl.BlockSpec((tb, Nx), lambda i: (i, 0)),
                # Constant index maps: weights stay VMEM-resident across tiles.
                pl.BlockSpec((Nx, N), lambda i: (0, 0)),
                pl.BlockSpec((N, N), lambda i: (0, 0)),
            ],
            out_specs=pl.BlockSpec((tb, N), lambda i: (i, 0)),
        ),
        compiler_params=pltpu.CompilerParams(
            dimension_semantics=("parallel",)),
    )(x, wxt, wt)

    return out[:B] if Bp != B else out


def _reference(x, wxt, wt, *, nt, eta, nonlinearity="tanh"):
    """Pure-JAX reference mirroring the PyTorch forward."""
    f = _nonlinearity(nonlinearity)
    xwxt = x @ wxt
    v = jnp.zeros_like(xwxt)
    for _ in range(nt):
        v = v + eta * (-v + f(v) @ wt + xwxt)
    return f(v)


if __name__ == "__main__":
    # Module hyperparameters (small, consistent with __init__ shapes).
    N = 128     # recurrent population size
    Nt = 10     # number of Euler steps
    rho = 1.5   # recurrent gain
    Nx = 32     # input dimension
    eta = 0.05  # step size
    B = 8       # batch

    key = jax.random.PRNGKey(0)
    k_wt, k_wxt, k_x, k_x2 = jax.random.split(key, 4)

    # Deterministic parameter init, matching the PyTorch __init__ recipe:
    #   WT  = rho * randn(N, N) / sqrt(N)
    #   WxT = randn(Nx, N) / sqrt(Nx)
    WT = rho * jax.random.normal(k_wt, (N, N), jnp.float32) / jnp.sqrt(jnp.float32(N))
    WxT = jax.random.normal(k_wxt, (Nx, N), jnp.float32) / jnp.sqrt(jnp.float32(Nx))

    x = jax.random.normal(k_x, (B, Nx), jnp.float32)
    ref = _reference(x, WxT, WT, nt=Nt, eta=eta)

    # Exact-arithmetic path (f32 MXU operands): tight tolerance vs reference.
    out_f32 = jax.block_until_ready(
        rate_model_type2(x, WxT, WT, nt=Nt, eta=eta, use_bf16_matmul=False))
    assert out_f32.shape == (B, N)
    assert jnp.allclose(out_f32, ref, atol=1e-4, rtol=1e-4), "f32 path mismatch (B=8)"

    # Default fast path (bf16 MXU operands, f32 state): bf16-appropriate tolerance.
    out_bf16 = jax.block_until_ready(rate_model_type2(x, WxT, WT, nt=Nt, eta=eta))
    assert out_bf16.shape == (B, N)
    assert jnp.allclose(out_bf16, ref, atol=3e-2, rtol=3e-2), "bf16 path mismatch (B=8)"

    # Padded / multi-tile path (forces >1 grid tile + batch padding).
    B2 = 40
    x2 = jax.random.normal(k_x2, (B2, Nx), jnp.float32)
    ref2 = _reference(x2, WxT, WT, nt=Nt, eta=eta)

    out2_f32 = jax.block_until_ready(
        rate_model_type2(x2, WxT, WT, nt=Nt, eta=eta, block_b=16,
                         use_bf16_matmul=False))
    assert out2_f32.shape == (B2, N)
    assert jnp.allclose(out2_f32, ref2, atol=1e-4, rtol=1e-4), "f32 path mismatch (B=40)"

    out2_bf16 = jax.block_until_ready(rate_model_type2(x2, WxT, WT, nt=Nt, eta=eta))
    assert out2_bf16.shape == (B2, N)
    assert jnp.allclose(out2_bf16, ref2, atol=3e-2, rtol=3e-2), "bf16 path mismatch (B=40)"

    print("KERNEL_OK")
</pallas_src>

<mosaic_0001>
module attributes {stable_mosaic.version = 11 : i64} {
  func.func @_rate_model_kernel(%arg0: i32, %arg1: memref<8x32xf32, #tpu.memory_space<vmem>>, %arg2: memref<32x128xf32, #tpu.memory_space<vmem>>, %arg3: memref<128x128xf32, #tpu.memory_space<vmem>>, %arg4: memref<8x128xf32, #tpu.memory_space<vmem>>) attributes {dimension_semantics = [#tpu.dimension_semantics<parallel>], iteration_bounds = array<i64: 1>, scalar_prefetch = 0 : i64, scratch_operands = 0 : i64, tpu.core_type = #tpu.core_type<tc>, window_params = [{transform_indices = @transform_0, window_bounds = array<i64: 8, 32>}, {pipeline_mode = #tpu.pipeline_mode<synchronous>, transform_indices = @transform_1, window_bounds = array<i64: 32, 128>}, {pipeline_mode = #tpu.pipeline_mode<synchronous>, transform_indices = @transform_2, window_bounds = array<i64: 128, 128>}, {transform_indices = @transform_3, window_bounds = array<i64: 8, 128>}]} {
    %c0 = arith.constant 0 : index
    %c0_0 = arith.constant 0 : index
    %0 = vector.load %arg1[%c0, %c0_0] : memref<8x32xf32, #tpu.memory_space<vmem>>, vector<8x32xf32>
    %c0_1 = arith.constant 0 : index
    %c0_2 = arith.constant 0 : index
    %1 = vector.load %arg2[%c0_1, %c0_2] : memref<32x128xf32, #tpu.memory_space<vmem>>, vector<32x128xf32>
    %cst = arith.constant dense<0.000000e+00> : vector<8x128xf32>
    %2 = tpu.matmul %0, %1, %cst {dimension_numbers = #tpu.dot_dimension_numbers<[1], [0], [0], [1], [0, 0, 1, 1], [], []>} : vector<8x32xf32>, vector<32x128xf32>, vector<8x128xf32> -> vector<8x128xf32>
    %cst_3 = arith.constant 5.000000e-02 : f32
    %3 = vector.broadcast %cst_3 : f32 to vector<8x128xf32>
    %4 = arith.mulf %3, %2 : vector<8x128xf32>
    %c0_4 = arith.constant 0 : index
    %c0_5 = arith.constant 0 : index
    %5 = vector.load %arg3[%c0_4, %c0_5] : memref<128x128xf32, #tpu.memory_space<vmem>>, vector<128x128xf32>
    %cst_6 = arith.constant 5.000000e-02 : f32
    %6 = vector.broadcast %cst_6 : f32 to vector<128x128xf32>
    %7 = arith.mulf %6, %5 : vector<128x128xf32>
    %8 = math.tanh %4 : vector<8x128xf32>
    %cst_7 = arith.constant 0.949999988 : f32
    %c0_i32 = arith.constant 0 : i32
    %cst_8 = arith.constant dense<0.000000e+00> : vector<8x128xf32>
    %9 = tpu.matmul %8, %7, %cst_8 {dimension_numbers = #tpu.dot_dimension_numbers<[1], [0], [0], [1], [0, 0, 1, 1], [], []>} : vector<8x128xf32>, vector<128x128xf32>, vector<8x128xf32> -> vector<8x128xf32>
    %10 = vector.broadcast %cst_7 : f32 to vector<8x128xf32>
    %11 = arith.mulf %10, %4 : vector<8x128xf32>
    %12 = arith.addf %11, %9 : vector<8x128xf32>
    %13 = arith.addf %12, %4 : vector<8x128xf32>
    %14 = math.tanh %13 : vector<8x128xf32>
    %c1_i32 = arith.constant 1 : i32
    %cst_9 = arith.constant dense<0.000000e+00> : vector<8x128xf32>
    %15 = tpu.matmul %14, %7, %cst_9 {dimension_numbers = #tpu.dot_dimension_numbers<[1], [0], [0], [1], [0, 0, 1, 1], [], []>} : vector<8x128xf32>, vector<128x128xf32>, vector<8x128xf32> -> vector<8x128xf32>
    %16 = vector.broadcast %cst_7 : f32 to vector<8x128xf32>
    %17 = arith.mulf %16, %13 : vector<8x128xf32>
    %18 = arith.addf %17, %15 : vector<8x128xf32>
    %19 = arith.addf %18, %4 : vector<8x128xf32>
    %20 = math.tanh %19 : vector<8x128xf32>
    %c2_i32 = arith.constant 2 : i32
    %cst_10 = arith.constant dense<0.000000e+00> : vector<8x128xf32>
    %21 = tpu.matmul %20, %7, %cst_10 {dimension_numbers = #tpu.dot_dimension_numbers<[1], [0], [0], [1], [0, 0, 1, 1], [], []>} : vector<8x128xf32>, vector<128x128xf32>, vector<8x128xf32> -> vector<8x128xf32>
    %22 = vector.broadcast %cst_7 : f32 to vector<8x128xf32>
    %23 = arith.mulf %22, %19 : vector<8x128xf32>
    %24 = arith.addf %23, %21 : vector<8x128xf32>
    %25 = arith.addf %24, %4 : vector<8x128xf32>
    %26 = math.tanh %25 : vector<8x128xf32>
    %c3_i32 = arith.constant 3 : i32
    %cst_11 = arith.constant dense<0.000000e+00> : vector<8x128xf32>
    %27 = tpu.matmul %26, %7, %cst_11 {dimension_numbers = #tpu.dot_dimension_numbers<[1], [0], [0], [1], [0, 0, 1, 1], [], []>} : vector<8x128xf32>, vector<128x128xf32>, vector<8x128xf32> -> vector<8x128xf32>
    %28 = vector.broadcast %cst_7 : f32 to vector<8x128xf32>
    %29 = arith.mulf %28, %25 : vector<8x128xf32>
    %30 = arith.addf %29, %27 : vector<8x128xf32>
    %31 = arith.addf %30, %4 : vector<8x128xf32>
    %32 = math.tanh %31 : vector<8x128xf32>
    %c4_i32 = arith.constant 4 : i32
    %cst_12 = arith.constant dense<0.000000e+00> : vector<8x128xf32>
    %33 = tpu.matmul %32, %7, %cst_12 {dimension_numbers = #tpu.dot_dimension_numbers<[1], [0], [0], [1], [0, 0, 1, 1], [], []>} : vector<8x128xf32>, vector<128x128xf32>, vector<8x128xf32> -> vector<8x128xf32>
    %34 = vector.broadcast %cst_7 : f32 to vector<8x128xf32>
    %35 = arith.mulf %34, %31 : vector<8x128xf32>
    %36 = arith.addf %35, %33 : vector<8x128xf32>
    %37 = arith.addf %36, %4 : vector<8x128xf32>
    %38 = math.tanh %37 : vector<8x128xf32>
    %c5_i32 = arith.constant 5 : i32
    %cst_13 = arith.constant dense<0.000000e+00> : vector<8x128xf32>
    %39 = tpu.matmul %38, %7, %cst_13 {dimension_numbers = #tpu.dot_dimension_numbers<[1], [0], [0], [1], [0, 0, 1, 1], [], []>} : vector<8x128xf32>, vector<128x128xf32>, vector<8x128xf32> -> vector<8x128xf32>
    %40 = vector.broadcast %cst_7 : f32 to vector<8x128xf32>
    %41 = arith.mulf %40, %37 : vector<8x128xf32>
    %42 = arith.addf %41, %39 : vector<8x128xf32>
    %43 = arith.addf %42, %4 : vector<8x128xf32>
    %44 = math.tanh %43 : vector<8x128xf32>
    %c6_i32 = arith.constant 6 : i32
    %cst_14 = arith.constant dense<0.000000e+00> : vector<8x128xf32>
    %45 = tpu.matmul %44, %7, %cst_14 {dimension_numbers = #tpu.dot_dimension_numbers<[1], [0], [0], [1], [0, 0, 1, 1], [], []>} : vector<8x128xf32>, vector<128x128xf32>, vector<8x128xf32> -> vector<8x128xf32>
    %46 = vector.broadcast %cst_7 : f32 to vector<8x128xf32>
    %47 = arith.mulf %46, %43 : vector<8x128xf32>
    %48 = arith.addf %47, %45 : vector<8x128xf32>
    %49 = arith.addf %48, %4 : vector<8x128xf32>
    %50 = math.tanh %49 : vector<8x128xf32>
    %c7_i32 = arith.constant 7 : i32
    %cst_15 = arith.constant dense<0.000000e+00> : vector<8x128xf32>
    %51 = tpu.matmul %50, %7, %cst_15 {dimension_numbers = #tpu.dot_dimension_numbers<[1], [0], [0], [1], [0, 0, 1, 1], [], []>} : vector<8x128xf32>, vector<128x128xf32>, vector<8x128xf32> -> vector<8x128xf32>
    %52 = vector.broadcast %cst_7 : f32 to vector<8x128xf32>
    %53 = arith.mulf %52, %49 : vector<8x128xf32>
    %54 = arith.addf %53, %51 : vector<8x128xf32>
    %55 = arith.addf %54, %4 : vector<8x128xf32>
    %56 = math.tanh %55 : vector<8x128xf32>
    %c8_i32 = arith.constant 8 : i32
    %cst_16 = arith.constant dense<0.000000e+00> : vector<8x128xf32>
    %57 = tpu.matmul %56, %7, %cst_16 {dimension_numbers = #tpu.dot_dimension_numbers<[1], [0], [0], [1], [0, 0, 1, 1], [], []>} : vector<8x128xf32>, vector<128x128xf32>, vector<8x128xf32> -> vector<8x128xf32>
    %58 = vector.broadcast %cst_7 : f32 to vector<8x128xf32>
    %59 = arith.mulf %58, %55 : vector<8x128xf32>
    %60 = arith.addf %59, %57 : vector<8x128xf32>
    %61 = arith.addf %60, %4 : vector<8x128xf32>
    %62 = math.tanh %61 : vector<8x128xf32>
    %c0_17 = arith.constant 0 : index
    %c0_18 = arith.constant 0 : index
    %63 = vector.load %arg4[%c0_17, %c0_18] : memref<8x128xf32, #tpu.memory_space<vmem>>, vector<8x128xf32>
    tpu.vector_store %arg4[%c0_17, %c0_18], %62 {strides = array<i32>} : memref<8x128xf32, #tpu.memory_space<vmem>>, vector<8x128xf32>,
    return
  }
  func.func @transform_0(%arg0: i32) -> (i32, i32) {
    %c0_i32 = arith.constant 0 : i32
    %c0_i32_0 = arith.constant 0 : i32
    return %arg0, %c0_i32 : i32, i32
  }
  func.func @transform_1(%arg0: i32) -> (i32, i32) {
    %c0_i32 = arith.constant 0 : i32
    %c0_i32_0 = arith.constant 0 : i32
    %c0_i32_1 = arith.constant 0 : i32
    return %c0_i32, %c0_i32_0 : i32, i32
  }
  func.func @transform_2(%arg0: i32) -> (i32, i32) {
    %c0_i32 = arith.constant 0 : i32
    %c0_i32_0 = arith.constant 0 : i32
    %c0_i32_1 = arith.constant 0 : i32
    return %c0_i32, %c0_i32_0 : i32, i32
  }
  func.func @transform_3(%arg0: i32) -> (i32, i32) {
    %c0_i32 = arith.constant 0 : i32
    %c0_i32_0 = arith.constant 0 : i32
    return %arg0, %c0_i32 : i32, i32
  }
}

</mosaic_0001>

<bundles_post_ra>
// kernel: tpu_custom_call.1
= control target key start
LH: loop header
LB: loop body
LE: loop exit
PB: predicated region body
PF: predicated region fallthrough
CT: control target
= control target key end

     0   :  { %8 = vsyncpa [#allocation3], 0  ;;  %s1958_s0 = inlined_call_operand.hbm [shape: f32[8,32], index: 0, kind: input, shape index: {}]   ;;  %s1959_s1 = inlined_call_operand.hbm [shape: f32[32,128], index: 1, kind: input, shape index: {}]   ;;  %s1960_s2 = inlined_call_operand.hbm [shape: f32[128,128], index: 2, kind: input, shape index: {}]   ;;  %s1961_s3 = inlined_call_operand.hbm [shape: f32[8,128], index: 3, kind: output, shape index: {}]  }
   0x1   :  { %9 = vsyncpa [#allocation6], 0 }
   0x2   :  { %10 = vsyncpa [#allocation4], 0  ;;  %s1680_s12 = smov [#allocation5]   ;;  %s1586_s16 = scalar_lea.hbm %s1959_s1, 512 }
   0x3   :  { %s26_s13 = sshll.u32 %s1680_s12, 4  ;;  %p1587_p0 = scmp.ne.s32.totalorder %s1959_s1, %s1586_s16  ;;  %s27_s13 = int_to_ptr.vmem [resolvable:$true] %s26_s13 }
   0x4   :  { %p1590_p1 = scmp.lt.u32.totalorder %s1586_s16, %s1959_s1 }
   0x6   :  { %p1592_p2 = pnand %p1590_p1, %p1587_p0 }
   0x8   :  { %1595 = shalt.err (!%p1592_p2)
}
   0x9   :  { %s1596_s21 = scalar_lea.vmem %s27_s13, 512  ;;  %p1601_p4 = scmp.lt.s32.totalorder %s27_s13, %s27_s13 }
   0xa   :  { %p1597_p3 = scmp.ne.s32.totalorder %s27_s13, %s1596_s21  ;;  %p1602_p5 = scmp.lt.s32.totalorder %s1596_s21, %s1596_s21 }
   0xc   :  { %p1603_p6 = por %p1602_p5, %p1601_p4 }
   0xe   :  { %p1604_p7 = pnand %p1603_p6, %p1597_p3 }
  0x10   :  { %1607 = shalt.err (!%p1604_p7)
}
  0x11   :  { %s1681_s22 = smov 128   ;;  %s1682_s23 = smov 8  }
  0x12   :  { %32 = dma.hbm_to_vmem [thread:$0]  %s1959_s1, 512, %s27_s13, [#allocation6], %s1681_s22, %s1681_s22, %s1682_s23  }
  0x13   :  { %s1683_s26 = smov [#allocation2]   ;;  %s1684_s28 = smov [#allocation7]  }
  0x14   :  { %s17_s27 = sshll.u32 %s1683_s26, 4  ;;  %s38_s29 = sshll.u32 %s1684_s28, 4  ;;  %s18_s27 = int_to_ptr.vmem [resolvable:$true] %s17_s27  ;;  %s39_s29 = int_to_ptr.vmem [resolvable:$true] %s38_s29 }
  0x15   :  { %s1608_s5 = scalar_lea.hbm %s1958_s0, 128 }
  0x16   :  { %p1609_p8 = scmp.ne.s32.totalorder %s1958_s0, %s1608_s5  ;;  %p1612_p9 = scmp.lt.u32.totalorder %s1608_s5, %s1958_s0 }
  0x18   :  { %p1614_p10 = pnand %p1612_p9, %p1609_p8 }
  0x1a   :  { %1617 = shalt.err (!%p1614_p10)
}
  0x1b   :  { %s1618_s1 = scalar_lea.vmem %s18_s27, 128  ;;  %p1623_p12 = scmp.lt.s32.totalorder %s18_s27, %s18_s27 }
  0x1c   :  { %p1619_p11 = scmp.ne.s32.totalorder %s18_s27, %s1618_s1  ;;  %p1624_p13 = scmp.lt.s32.totalorder %s1618_s1, %s1618_s1 }
  0x1e   :  { %p1625_p0 = por %p1624_p13, %p1623_p12 }
  0x20   :  { %p1626_p1 = pnand %p1625_p0, %p1619_p11 }
  0x22   :  { %1629 = shalt.err (!%p1626_p1)
}
  0x23   :  { %20 = dma.hbm_to_vmem [thread:$0]  %s1958_s0, 128, %s18_s27, [#allocation3]  }
  0x24   :  { %s1630_s14 = scalar_lea.hbm %s1960_s2, 2048 }
  0x25   :  { %p1631_p2 = scmp.ne.s32.totalorder %s1960_s2, %s1630_s14  ;;  %p1634_p3 = scmp.lt.u32.totalorder %s1630_s14, %s1960_s2 }
  0x27   :  { %p1636_p4 = pnand %p1634_p3, %p1631_p2 }
  0x29   :  { %1639 = shalt.err (!%p1636_p4)
}
  0x2a   :  { %s1640_s19 = scalar_lea.vmem %s39_s29, 2048  ;;  %p1645_p6 = scmp.lt.s32.totalorder %s39_s29, %s39_s29 }
  0x2b   :  { %p1641_p5 = scmp.ne.s32.totalorder %s39_s29, %s1640_s19  ;;  %p1646_p7 = scmp.lt.s32.totalorder %s1640_s19, %s1640_s19 }
  0x2d   :  { %p1647_p8 = por %p1646_p7, %p1645_p6 }
  0x2f   :  { %p1648_p9 = pnand %p1647_p8, %p1641_p5 }
  0x31   :  { %1651 = shalt.err (!%p1648_p9)
}
  0x32   :  { %44 = dma.hbm_to_vmem [thread:$0]  %s1960_s2, 2048, %s39_s29, [#allocation6], %s1681_s22, %s1681_s22, %s1682_s23  }
  0x33   :  { %1674 = dma.done.wait [#allocation3], 128  }
  0x34   :  { %1675 = vsyncadd [#allocation3], 4294967168 }
  0x35   :  { %1676 = dma.done.wait [#allocation6], 2560  }
  0x36   :  { %1677 = vsyncadd [#allocation6], 4294964736  ;;  %v1685_v0 = vmov 0.0|0.0   ;;  %vm1686_vm0 = vmmov 0   ;;  %v1687_v1 = vmov 0.0   ;;  %v55_v2 = vld [vmem:[#allocation5] sm:$0xff] }
  0x37   :  { %1335 = vmatprep.subr.bf16.mxu0 %v1685_v0  ;;  %1017 = vmatprep.mubr.msk.f32.mxu0 %vm1686_vm0, %v1687_v1  ;;  %v56_v3 = vld [vmem:[#allocation5 + $0x8] sm:$0xff]  ;;  %v57_v4 = vld [vmem:[#allocation5 + $0x10] sm:$0xff]  ;;  %v58_v6 = vld [vmem:[#allocation5 + $0x18] sm:$0xff]  ;;  %vm59_vm1 = vcmask 261120   ;;  %s1688_s2 = smov [#allocation8]  }
  0x38   :  { %1341 = vmatprep.subr.bf16.mxu1 %v1685_v0  ;;  %1052 = vmatprep.mubr.msk.f32.mxu1 %vm1686_vm0, %v1687_v1  ;;  %v1336_v5 = vpack.c.bf16 %v56_v3, %v55_v2  ;;  %v134_v7 = vld [vmem:[#allocation7] sm:$0xff]  ;;  %v135_v8 = vld [vmem:[#allocation7 + $0x8] sm:$0xff]  ;;  %v136_v10 = vld [vmem:[#allocation7 + $0x10] sm:$0xff]  ;;  %v1339_v12 = vpack.c.bf16 %v58_v6, %v57_v4  ;;  %s840_s21 = sshll.u32 %s1688_s2, 4  ;;  %s841_s21 = int_to_ptr.vmem [resolvable:$true] %s840_s21 }
  0x39   :  { %v150_v9 = vmul.f32 0.05, %v134_v7  ;;  %v137_v11 = vld [vmem:[#allocation7 + $0x18] sm:$0xff]  ;;  %v151_v13 = vmul.f32 0.05, %v135_v8  ;;  %v138_v16 = vld [vmem:[#allocation7 + $0x20] sm:$0xff]  ;;  %p1657_p11 = scmp.lt.s32.totalorder %s841_s21, %s841_s21 }
  0x3a   :  { %1337 = vmatpush3.bf16.msra.mxu0 %v1336_v5  ;;  %v152_v14 = vmul.f32 0.05, %v136_v10  ;;  %v153_v15 = vmul.f32 0.05, %v137_v11  ;;  %v139_v17 = vld [vmem:[#allocation7 + $0x28] sm:$0xff]  ;;  %v54_v19 = vld [vmem:[#allocation2] sm:$0xff] }
  0x3b   :  { %1338 = vmatprep.subr.bf16.mxu0 %v1685_v0  ;;  %v1758_v18 = vpack.c.bf16 %v151_v13, %v150_v9  ;;  %v154_v21 = vmul.f32 0.05, %v138_v16  ;;  %v155_v22 = vmul.f32 0.05, %v139_v17  ;;  %v140_v23 = vld [vmem:[#allocation7 + $0x30] sm:$0xff]  ;;  %v141_v24 = vld [vmem:[#allocation7 + $0x38] sm:$0xff] }
  0x3c   :  { %v1761_v20 = vpack.c.bf16 %v153_v15, %v152_v14  ;;  %v156_v26 = vmul.f32 0.05, %v140_v23  ;;  %v157_v27 = vmul.f32 0.05, %v141_v24  ;;  %v142_v28 = vld [vmem:[#allocation7 + $0x40] sm:$0xff]  ;;  %v143_v29 = vld [vmem:[#allocation7 + $0x48] sm:$0xff] }
  0x3d   :  { %1343 = vmatpush3.bf16.msra.mxu1 %v1758_v18  ;;  %v1766_v25 = vpack.c.bf16 %v155_v22, %v154_v21  ;;  %v158_v31 = vmul.f32 0.05, %v142_v28  ;;  %v159_v32 = vmul.f32 0.05, %v143_v29  ;;  %v144_v34 = vld [vmem:[#allocation7 + $0x50] sm:$0xff]  ;;  %v145_v35 = vld [vmem:[#allocation7 + $0x58] sm:$0xff] }
  0x3e   :  { %1340 = vmatpush3.bf16.msra.mxu0 %v1339_v12  ;;  %1344 = vmatprep.subr.bf16.mxu1 %v1685_v0  ;;  %v1774_v30 = vpack.c.bf16 %v157_v27, %v156_v26  ;;  %v160_v36 = vmul.f32 0.05, %v144_v34  ;;  %v161_v37 = vmul.f32 0.05, %v145_v35  ;;  %v146_v39 = vld [vmem:[#allocation7 + $0x60] sm:$0xff]  ;;  %v147_v40 = vld [vmem:[#allocation7 + $0x68] sm:$0xff] }
  0x3f   :  { %1365 = vmatprep.subr.bf16.mxu0 %v1685_v0  ;;  %v1780_v33 = vpack.c.bf16 %v159_v32, %v158_v31  ;;  %v148_v41 = vld [vmem:[#allocation7 + $0x70] sm:$0xff]  ;;  %v162_v42 = vmul.f32 0.05, %v146_v39  ;;  %v163_v43 = vmul.f32 0.05, %v147_v40  ;;  %v149_v44 = vld [vmem:[#allocation7 + $0x78] sm:$0xff] }
  0x40   :  { %v1791_v38 = vpack.c.bf16 %v161_v37, %v160_v36  ;;  %v164_v45 = vmul.f32 0.05, %v148_v41  ;;  %v165_v46 = vmul.f32 0.05, %v149_v44  ;;  %s1652_s22 = scalar_lea.vmem %s841_s21, 128 }
  0x41   :  { %1018 = vmatmul.mubr.msk.f32.vlgmr.msra.gmra.mrb[0].mxu0 %vm59_vm1, %v54_v19  ;;  %1346 = vmatpush3.bf16.msra.mxu1 %v1761_v20  ;;  %v1796_v47 = vpack.c.bf16 %v163_v43, %v162_v42  ;;  %p1653_p10 = scmp.ne.s32.totalorder %s841_s21, %s1652_s22  ;;  %p1658_p12 = scmp.lt.s32.totalorder %s1652_s22, %s1652_s22 }
  0x42   :  { %1367 = vmatpush3.bf16.msra.mxu0 %v1758_v18  ;;  %1347 = vmatprep.subr.bf16.mxu1 %v1685_v0  ;;  %v1800_v48 = vpack.c.bf16 %v165_v46, %v164_v45 }
  0x43   :  { %1368 = vmatprep.subr.bf16.mxu0 %v1685_v0  ;;  %1087 = vmatprep.mubr.msk.f32.mxu0 %vm1686_vm0, %v1687_v1  ;;  %p1659_p13 = por %p1658_p12, %p1657_p11 }
  0x45   :  { %1349 = vmatpush3.bf16.msra.mxu1 %v1766_v25  ;;  %p1660_p0 = pnand %p1659_p13, %p1653_p10 }
  0x46   :  { %1370 = vmatpush3.bf16.msra.mxu0 %v1761_v20  ;;  %1350 = vmatprep.subr.bf16.mxu1 %v1685_v0 }
  0x47   :  { %1371 = vmatprep.subr.bf16.mxu0 %v1685_v0 }
  0x49   :  { %1352 = vmatpush3.bf16.msra.mxu1 %v1774_v30 }
  0x4a   :  { %1373 = vmatpush3.bf16.msra.mxu0 %v1766_v25  ;;  %1353 = vmatprep.subr.bf16.mxu1 %v1685_v0 }
  0x4b   :  { %1374 = vmatprep.subr.bf16.mxu0 %v1685_v0 }
  0x4d   :  { %1355 = vmatpush3.bf16.msra.mxu1 %v1780_v33 }
  0x4e   :  { %1376 = vmatpush3.bf16.msra.mxu0 %v1774_v30  ;;  %1356 = vmatprep.subr.bf16.mxu1 %v1685_v0 }
  0x4f   :  { %1377 = vmatprep.subr.bf16.mxu0 %v1685_v0 }
  0x51   :  { %1358 = vmatpush3.bf16.msra.mxu1 %v1791_v38 }
  0x52   :  { %1379 = vmatpush3.bf16.msra.mxu0 %v1780_v33  ;;  %1359 = vmatprep.subr.bf16.mxu1 %v1685_v0 }
  0x53   :  { %1380 = vmatprep.subr.bf16.mxu0 %v1685_v0 }
  0x55   :  { %1361 = vmatpush3.bf16.msra.mxu1 %v1796_v47 }
  0x56   :  { %1382 = vmatpush3.bf16.msra.mxu0 %v1791_v38  ;;  %1362 = vmatprep.subr.bf16.mxu1 %v1685_v0 }
  0x57   :  { %1383 = vmatprep.subr.bf16.mxu0 %v1685_v0 }
  0x59   :  { %1364 = vmatpush3.bf16.msra.mxu1 %v1800_v48 }
  0x5a   :  { %1385 = vmatpush3.bf16.msra.mxu0 %v1796_v47  ;;  %1389 = vmatprep.subr.bf16.mxu1 %v1685_v0 }
  0x5b   :  { %1386 = vmatprep.subr.bf16.mxu0 %v1685_v0 }
  0x5e   :  { %1388 = vmatpush3.bf16.msra.mxu0 %v1800_v48 }
  0x5f   :  { %1413 = vmatprep.subr.bf16.mxu0 %v1685_v0 }
 0x114   :  { %v129_v49 = vpop.f32.mrb[0].mxu0 }
 0x115   :  { %v1809_v50 = vmul.f32 0.05, %v129_v49  ;;  %v1019_v51 = vpop.f32.mrb[1].mxu0 }
 0x117   :  { %1566 = vtanh.f32 %v1809_v50  ;;  %v237_v53 = vmul.f32 0.95, %v1809_v50 }
 0x121   :  { %v1567_v52 = vpop.eup %1566 }
 0x122   :  { %1053 = vmatmul.mubr.f32.vlgmr.msra.gmra.mrb[0].mxu1 %v1567_v52 }
 0x123   :  { %1391 = vmatpush3.bf16.msra.mxu1 %v1758_v18  ;;  %1122 = vmatprep.mubr.msk.f32.mxu1 %vm1686_vm0, %v1687_v1 }
 0x124   :  { %1392 = vmatprep.subr.bf16.mxu1 %v1685_v0 }
 0x127   :  { %1394 = vmatpush3.bf16.msra.mxu1 %v1761_v20 }
 0x128   :  { %1395 = vmatprep.subr.bf16.mxu1 %v1685_v0 }
 0x12b   :  { %1397 = vmatpush3.bf16.msra.mxu1 %v1766_v25 }
 0x12c   :  { %1398 = vmatprep.subr.bf16.mxu1 %v1685_v0 }
 0x12f   :  { %1400 = vmatpush3.bf16.msra.mxu1 %v1774_v30 }
 0x130   :  { %1401 = vmatprep.subr.bf16.mxu1 %v1685_v0 }
 0x133   :  { %1403 = vmatpush3.bf16.msra.mxu1 %v1780_v33 }
 0x134   :  { %1404 = vmatprep.subr.bf16.mxu1 %v1685_v0 }
 0x137   :  { %1406 = vmatpush3.bf16.msra.mxu1 %v1791_v38 }
 0x138   :  { %1407 = vmatprep.subr.bf16.mxu1 %v1685_v0 }
 0x13b   :  { %1409 = vmatpush3.bf16.msra.mxu1 %v1796_v47 }
 0x13c   :  { %1410 = vmatprep.subr.bf16.mxu1 %v1685_v0 }
 0x13f   :  { %1412 = vmatpush3.bf16.msra.mxu1 %v1800_v48 }
 0x140   :  { %1437 = vmatprep.subr.bf16.mxu1 %v1685_v0 }
 0x1f5   :  { %v233_v54 = vpop.f32.mrb[0].mxu1 }
 0x1f6   :  { %v238_v55 = vadd.f32 %v237_v53, %v233_v54  ;;  %v1054_v56 = vpop.f32.mrb[1].mxu1 }
 0x1f8   :  { %v239_v57 = vadd.f32 %v238_v55, %v1809_v50 }
 0x1fa   :  { %1568 = vtanh.f32 %v239_v57  ;;  %v311_v59 = vmul.f32 0.95, %v239_v57 }
 0x204   :  { %v1569_v58 = vpop.eup %1568 }
 0x205   :  { %1088 = vmatmul.mubr.f32.vlgmr.msra.gmra.mrb[2].mxu0 %v1569_v58 }
 0x206   :  { %1415 = vmatpush3.bf16.msra.mxu0 %v1758_v18  ;;  %1157 = vmatprep.mubr.msk.f32.mxu0 %vm1686_vm0, %v1687_v1 }
 0x207   :  { %1416 = vmatprep.subr.bf16.mxu0 %v1685_v0 }
 0x20a   :  { %1418 = vmatpush3.bf16.msra.mxu0 %v1761_v20 }
 0x20b   :  { %1419 = vmatprep.subr.bf16.mxu0 %v1685_v0 }
 0x20e   :  { %1421 = vmatpush3.bf16.msra.mxu0 %v1766_v25 }
 0x20f   :  { %1422 = vmatprep.subr.bf16.mxu0 %v1685_v0 }
 0x212   :  { %1424 = vmatpush3.bf16.msra.mxu0 %v1774_v30 }
 0x213   :  { %1425 = vmatprep.subr.bf16.mxu0 %v1685_v0 }
 0x216   :  { %1427 = vmatpush3.bf16.msra.mxu0 %v1780_v33 }
 0x217   :  { %1428 = vmatprep.subr.bf16.mxu0 %v1685_v0 }
 0x21a   :  { %1430 = vmatpush3.bf16.msra.mxu0 %v1791_v38 }
 0x21b   :  { %1431 = vmatprep.subr.bf16.mxu0 %v1685_v0 }
 0x21e   :  { %1433 = vmatpush3.bf16.msra.mxu0 %v1796_v47 }
 0x21f   :  { %1434 = vmatprep.subr.bf16.mxu0 %v1685_v0 }
 0x222   :  { %1436 = vmatpush3.bf16.msra.mxu0 %v1800_v48 }
 0x223   :  { %1461 = vmatprep.subr.bf16.mxu0 %v1685_v0 }
 0x2d8   :  { %v307_v60 = vpop.f32.mrb[2].mxu0 }
 0x2d9   :  { %v312_v61 = vadd.f32 %v311_v59, %v307_v60  ;;  %v1089_v62 = vpop.f32.mrb[3].mxu0 }
 0x2db   :  { %v313_v63 = vadd.f32 %v312_v61, %v1809_v50 }
 0x2dd   :  { %1570 = vtanh.f32 %v313_v63  ;;  %v385_v3 = vmul.f32 0.95, %v313_v63 }
 0x2e7   :  { %v1571_v2 = vpop.eup %1570 }
 0x2e8   :  { %1123 = vmatmul.mubr.f32.vlgmr.msra.gmra.mrb[2].mxu1 %v1571_v2 }
 0x2e9   :  { %1439 = vmatpush3.bf16.msra.mxu1 %v1758_v18  ;;  %1192 = vmatprep.mubr.msk.f32.mxu1 %vm1686_vm0, %v1687_v1 }
 0x2ea   :  { %1440 = vmatprep.subr.bf16.mxu1 %v1685_v0 }
 0x2ed   :  { %1442 = vmatpush3.bf16.msra.mxu1 %v1761_v20 }
 0x2ee   :  { %1443 = vmatprep.subr.bf16.mxu1 %v1685_v0 }
 0x2f1   :  { %1445 = vmatpush3.bf16.msra.mxu1 %v1766_v25 }
 0x2f2   :  { %1446 = vmatprep.subr.bf16.mxu1 %v1685_v0 }
 0x2f5   :  { %1448 = vmatpush3.bf16.msra.mxu1 %v1774_v30 }
 0x2f6   :  { %1449 = vmatprep.subr.bf16.mxu1 %v1685_v0 }
 0x2f9   :  { %1451 = vmatpush3.bf16.msra.mxu1 %v1780_v33 }
 0x2fa   :  { %1452 = vmatprep.subr.bf16.mxu1 %v1685_v0 }
 0x2fd   :  { %1454 = vmatpush3.bf16.msra.mxu1 %v1791_v38 }
 0x2fe   :  { %1455 = vmatprep.subr.bf16.mxu1 %v1685_v0 }
 0x301   :  { %1457 = vmatpush3.bf16.msra.mxu1 %v1796_v47 }
 0x302   :  { %1458 = vmatprep.subr.bf16.mxu1 %v1685_v0 }
 0x305   :  { %1460 = vmatpush3.bf16.msra.mxu1 %v1800_v48 }
 0x306   :  { %1485 = vmatprep.subr.bf16.mxu1 %v1685_v0 }
 0x3bb   :  { %v381_v4 = vpop.f32.mrb[2].mxu1 }
 0x3bc   :  { %v386_v5 = vadd.f32 %v385_v3, %v381_v4  ;;  %v1124_v6 = vpop.f32.mrb[3].mxu1 }
 0x3be   :  { %v387_v7 = vadd.f32 %v386_v5, %v1809_v50 }
 0x3c0   :  { %1572 = vtanh.f32 %v387_v7  ;;  %v459_v9 = vmul.f32 0.95, %v387_v7 }
 0x3ca   :  { %v1573_v8 = vpop.eup %1572 }
 0x3cb   :  { %1158 = vmatmul.mubr.f32.vlgmr.msra.gmra.mrb[4].mxu0 %v1573_v8 }
 0x3cc   :  { %1463 = vmatpush3.bf16.msra.mxu0 %v1758_v18  ;;  %1227 = vmatprep.mubr.msk.f32.mxu0 %vm1686_vm0, %v1687_v1 }
 0x3cd   :  { %1464 = vmatprep.subr.bf16.mxu0 %v1685_v0 }
 0x3d0   :  { %1466 = vmatpush3.bf16.msra.mxu0 %v1761_v20 }
 0x3d1   :  { %1467 = vmatprep.subr.bf16.mxu0 %v1685_v0 }
 0x3d4   :  { %1469 = vmatpush3.bf16.msra.mxu0 %v1766_v25 }
 0x3d5   :  { %1470 = vmatprep.subr.bf16.mxu0 %v1685_v0 }
 0x3d8   :  { %1472 = vmatpush3.bf16.msra.mxu0 %v1774_v30 }
 0x3d9   :  { %1473 = vmatprep.subr.bf16.mxu0 %v1685_v0 }
 0x3dc   :  { %1475 = vmatpush3.bf16.msra.mxu0 %v1780_v33 }
 0x3dd   :  { %1476 = vmatprep.subr.bf16.mxu0 %v1685_v0 }
 0x3e0   :  { %1478 = vmatpush3.bf16.msra.mxu0 %v1791_v38 }
 0x3e1   :  { %1479 = vmatprep.subr.bf16.mxu0 %v1685_v0 }
 0x3e4   :  { %1481 = vmatpush3.bf16.msra.mxu0 %v1796_v47 }
 0x3e5   :  { %1482 = vmatprep.subr.bf16.mxu0 %v1685_v0 }
 0x3e8   :  { %1484 = vmatpush3.bf16.msra.mxu0 %v1800_v48 }
 0x3e9   :  { %1509 = vmatprep.subr.bf16.mxu0 %v1685_v0 }
 0x49e   :  { %v455_v10 = vpop.f32.mrb[4].mxu0 }
 0x49f   :  { %v460_v11 = vadd.f32 %v459_v9, %v455_v10  ;;  %v1159_v12 = vpop.f32.mrb[5].mxu0 }
 0x4a1   :  { %v461_v13 = vadd.f32 %v460_v11, %v1809_v50 }
 0x4a3   :  { %1574 = vtanh.f32 %v461_v13  ;;  %v533_v15 = vmul.f32 0.95, %v461_v13 }
 0x4ad   :  { %v1575_v14 = vpop.eup %1574 }
 0x4ae   :  { %1193 = vmatmul.mubr.f32.vlgmr.msra.gmra.mrb[4].mxu1 %v1575_v14 }
 0x4af   :  { %1487 = vmatpush3.bf16.msra.mxu1 %v1758_v18  ;;  %1262 = vmatprep.mubr.msk.f32.mxu1 %vm1686_vm0, %v1687_v1 }
 0x4b0   :  { %1488 = vmatprep.subr.bf16.mxu1 %v1685_v0 }
 0x4b3   :  { %1490 = vmatpush3.bf16.msra.mxu1 %v1761_v20 }
 0x4b4   :  { %1491 = vmatprep.subr.bf16.mxu1 %v1685_v0 }
 0x4b7   :  { %1493 = vmatpush3.bf16.msra.mxu1 %v1766_v25 }
 0x4b8   :  { %1494 = vmatprep.subr.bf16.mxu1 %v1685_v0 }
 0x4bb   :  { %1496 = vmatpush3.bf16.msra.mxu1 %v1774_v30 }
 0x4bc   :  { %1497 = vmatprep.subr.bf16.mxu1 %v1685_v0 }
 0x4bf   :  { %1499 = vmatpush3.bf16.msra.mxu1 %v1780_v33 }
 0x4c0   :  { %1500 = vmatprep.subr.bf16.mxu1 %v1685_v0 }
 0x4c3   :  { %1502 = vmatpush3.bf16.msra.mxu1 %v1791_v38 }
 0x4c4   :  { %1503 = vmatprep.subr.bf16.mxu1 %v1685_v0 }
 0x4c7   :  { %1505 = vmatpush3.bf16.msra.mxu1 %v1796_v47 }
 0x4c8   :  { %1506 = vmatprep.subr.bf16.mxu1 %v1685_v0 }
 0x4cb   :  { %1508 = vmatpush3.bf16.msra.mxu1 %v1800_v48 }
 0x4cc   :  { %1533 = vmatprep.subr.bf16.mxu1 %v1685_v0 }
 0x581   :  { %v529_v16 = vpop.f32.mrb[4].mxu1 }
 0x582   :  { %v534_v17 = vadd.f32 %v533_v15, %v529_v16  ;;  %v1194_v19 = vpop.f32.mrb[5].mxu1 }
 0x584   :  { %v535_v21 = vadd.f32 %v534_v17, %v1809_v50 }
 0x586   :  { %1576 = vtanh.f32 %v535_v21  ;;  %v607_v23 = vmul.f32 0.95, %v535_v21 }
 0x590   :  { %v1577_v22 = vpop.eup %1576 }
 0x591   :  { %1228 = vmatmul.mubr.f32.vlgmr.msra.gmra.mrb[6].mxu0 %v1577_v22 }
 0x592   :  { %1511 = vmatpush3.bf16.msra.mxu0 %v1758_v18  ;;  %1297 = vmatprep.mubr.msk.f32.mxu0 %vm1686_vm0, %v1687_v1 }
 0x593   :  { %1512 = vmatprep.subr.bf16.mxu0 %v1685_v0 }
 0x596   :  { %1514 = vmatpush3.bf16.msra.mxu0 %v1761_v20 }
 0x597   :  { %1515 = vmatprep.subr.bf16.mxu0 %v1685_v0 }
 0x59a   :  { %1517 = vmatpush3.bf16.msra.mxu0 %v1766_v25 }
 0x59b   :  { %1518 = vmatprep.subr.bf16.mxu0 %v1685_v0 }
 0x59e   :  { %1520 = vmatpush3.bf16.msra.mxu0 %v1774_v30 }
 0x59f   :  { %1521 = vmatprep.subr.bf16.mxu0 %v1685_v0 }
 0x5a2   :  { %1523 = vmatpush3.bf16.msra.mxu0 %v1780_v33 }
 0x5a3   :  { %1524 = vmatprep.subr.bf16.mxu0 %v1685_v0 }
 0x5a6   :  { %1526 = vmatpush3.bf16.msra.mxu0 %v1791_v38 }
 0x5a7   :  { %1527 = vmatprep.subr.bf16.mxu0 %v1685_v0 }
 0x5aa   :  { %1529 = vmatpush3.bf16.msra.mxu0 %v1796_v47 }
 0x5ab   :  { %1530 = vmatprep.subr.bf16.mxu0 %v1685_v0 }
 0x5ae   :  { %1532 = vmatpush3.bf16.msra.mxu0 %v1800_v48 }
 0x664   :  { %v603_v24 = vpop.f32.mrb[6].mxu0 }
 0x665   :  { %v608_v26 = vadd.f32 %v607_v23, %v603_v24  ;;  %v1229_v27 = vpop.f32.mrb[7].mxu0 }
 0x667   :  { %v609_v28 = vadd.f32 %v608_v26, %v1809_v50 }
 0x669   :  { %1578 = vtanh.f32 %v609_v28 }
 0x673   :  { %v1579_v29 = vpop.eup %1578 }
 0x674   :  { %1263 = vmatmul.mubr.f32.vlgmr.msra.gmra.mrb[6].mxu1 %v1579_v29 }
 0x675   :  { %1535 = vmatpush3.bf16.msra.mxu1 %v1758_v18  ;;  %1332 = vmatprep.mubr.msk.f32.mxu1 %vm1686_vm0, %v1687_v1  ;;  %v681_v1 = vmul.f32 0.95, %v609_v28 }
 0x676   :  { %1536 = vmatprep.subr.bf16.mxu1 %v1685_v0 }
 0x679   :  { %1538 = vmatpush3.bf16.msra.mxu1 %v1761_v20 }
 0x67a   :  { %1539 = vmatprep.subr.bf16.mxu1 %v1685_v0 }
 0x67d   :  { %1541 = vmatpush3.bf16.msra.mxu1 %v1766_v25 }
 0x67e   :  { %1542 = vmatprep.subr.bf16.mxu1 %v1685_v0 }
 0x681   :  { %1544 = vmatpush3.bf16.msra.mxu1 %v1774_v30 }
 0x682   :  { %1545 = vmatprep.subr.bf16.mxu1 %v1685_v0 }
 0x685   :  { %1547 = vmatpush3.bf16.msra.mxu1 %v1780_v33 }
 0x686   :  { %1548 = vmatprep.subr.bf16.mxu1 %v1685_v0 }
 0x689   :  { %1550 = vmatpush3.bf16.msra.mxu1 %v1791_v38 }
 0x68a   :  { %1551 = vmatprep.subr.bf16.mxu1 %v1685_v0 }
 0x68d   :  { %1553 = vmatpush3.bf16.msra.mxu1 %v1796_v47 }
 0x68e   :  { %1554 = vmatprep.subr.bf16.mxu1 %v1685_v0 }
 0x691   :  { %1556 = vmatpush3.bf16.msra.mxu1 %v1800_v48 }
 0x747   :  { %v677_v18 = vpop.f32.mrb[6].mxu1 }
 0x748   :  { %v682_v20 = vadd.f32 %v681_v1, %v677_v18  ;;  %v1264_v25 = vpop.f32.mrb[7].mxu1 }
 0x74a   :  { %v683_v30 = vadd.f32 %v682_v20, %v1809_v50 }
 0x74c   :  { %1580 = vtanh.f32 %v683_v30  ;;  %v755_v32 = vmul.f32 0.95, %v683_v30 }
 0x756   :  { %v1581_v31 = vpop.eup %1580 }
 0x757   :  { %1298 = vmatmul.mubr.f32.vlgmr.msra.gmra.mrb[8].mxu0 %v1581_v31 }
 0x82a   :  { %v751_v33 = vpop.f32.mrb[8].mxu0 }
 0x82b   :  { %v756_v34 = vadd.f32 %v755_v32, %v751_v33  ;;  %v1299_v35 = vpop.f32.mrb[9].mxu0 }
 0x82d   :  { %v757_v36 = vadd.f32 %v756_v34, %v1809_v50 }
 0x82f   :  { %1582 = vtanh.f32 %v757_v36  ;;  %v829_v0 = vmul.f32 0.95, %v757_v36 }
 0x839   :  { %v1583_v37 = vpop.eup %1582 }
 0x83a   :  { %1333 = vmatmul.mubr.f32.vlgmr.msra.gmra.mrb[8].mxu1 %v1583_v37 }
 0x90d   :  { %v825_v38 = vpop.f32.mrb[8].mxu1 }
 0x90e   :  { %v830_v39 = vadd.f32 %v829_v0, %v825_v38  ;;  %v1334_v40 = vpop.f32.mrb[9].mxu1 }
 0x910   :  { %v831_v41 = vadd.f32 %v830_v39, %v1809_v50 }
 0x912   :  { %1584 = vtanh.f32 %v831_v41 }
 0x91c   :  { %v1585_v42 = vpop.eup %1584 }
 0x91d   :  { %833 = vst [vmem:[#allocation8] sm:$0xff] %v1585_v42 }
 0x91e   :  { %1663 = shalt.err (!%p1660_p0)
}
 0x91f   :  { %s1664_s25 = scalar_lea.hbm %s1961_s3, 128 }
 0x920   :  { %p1665_p1 = scmp.ne.s32.totalorder %s1961_s3, %s1664_s25  ;;  %p1668_p2 = scmp.lt.u32.totalorder %s1664_s25, %s1961_s3 }
 0x922   :  { %p1670_p3 = pnand %p1668_p2, %p1665_p1 }
 0x924   :  { %1673 = shalt.err (!%p1670_p3)
}
 0x925   :  { %843 = dma.vmem_to_hbm [thread:$0]  %s841_s21, 128, %s1961_s3, [#allocation4]  }
 0x926   :  { %1678 = dma.done.wait [#allocation4], 128  }
 0x927   :  { %1679 = vsyncadd [#allocation4], 4294967168 }
 0x928   :  { %847 = vsyncpa [#allocation3], 1 }
 0x929   :  { %848 = vsyncpa [#allocation6], 1 }
 0x92a   :  { %849 = vsyncpa [#allocation4], 1 }

</bundles_post_ra>
